<compile_context>
chip_gen: v5e
topology: v5e:2x2
jax: 0.10.0
libtpu: 0.0.40
codegen_flags: <defaults>
</compile_context>

<pallas_src>
from functools import partial
from math import pi

import jax
import jax.numpy as jnp
from jax.experimental import pallas as pl
from jax.experimental.pallas import tpu as pltpu


# ---------------------------------------------------------------------------------
# Fused Pallas kernel. One grid step == one batch element == one whole chunk.
#   activations: (channels, chunk_length)  -> time on the 128-lane axis
#   conv weights: (Cout, 3*Cin) bf16 — the 3 taps live on the contraction axis.
# ---------------------------------------------------------------------------------
def _fused_diffusion_kernel(scal_ref, temb_ref, xc_ref, xp_ref, nz_ref,
                            w1_ref, b1_ref, w2_ref, b2_ref, w3_ref, b3_ref,
                            loss_ref):
    f32 = jnp.float32
    bf16 = jnp.bfloat16

    xc = xc_ref[...].astype(f32)        # (C, L)  current chunk
    xp = xp_ref[...].astype(f32)        # (C, L)  previous chunk (conditioning)
    nz = nz_ref[...].astype(f32)        # (C, L)  gaussian noise
    temb = temb_ref[...].astype(f32)    # (H, 1)  per-batch time embedding
    sc = scal_ref[...].astype(f32)      # (3, 1)  alpha, beta, keep

    C, L = xc.shape
    alpha = sc[0:1, :]                  # (1,1) broadcasts over (C, L)
    beta = sc[1:2, :]
    keep = sc[2:3, :]

    # Chunk-boundary masks built in-kernel (block == one chunk, so lane index == t).
    t_idx = jax.lax.broadcasted_iota(jnp.int32, (1, L), 1)
    not_first = (t_idx > 0).astype(f32)         # zero at t = 0
    not_last = (t_idx < L - 1).astype(f32)      # zero at t = L - 1

    # --- v-diffusion mixing + per-batch conditioning dropout (VPU, f32) ----------
    x_noisy = alpha * xc + beta * nz
    v_target = alpha * nz - beta * xc
    ctx = keep * xp

    def stack3(a):
        # Conv1d(k=3, pad=1) taps on the contraction axis:
        #   (Cin, L) -> (3*Cin, L) = [a[t-1]; a[t]; a[t+1]]
        # Zero padding at the chunk edges handled in-register with XLU rolls + masks.
        prev = pltpu.roll(a, shift=1, axis=1) * not_first       # row t <- a[t-1]
        nxt = pltpu.roll(a, shift=L - 1, axis=1) * not_last     # row t <- a[t+1]
        return jnp.concatenate([prev, a, nxt], axis=0)

    def conv(w_ref, act):
        # bf16 weights (pre-cast at init) x bf16 activations; f32 accumulation.
        return jnp.dot(w_ref[...], act.astype(bf16), preferred_element_type=f32)

    # Layer 1: Conv1d(2C -> H) + bias + time-embedding bias + SiLU (single matmul,
    # x_noisy and the conditioning chunk stacked on K).
    a1 = stack3(jnp.concatenate([x_noisy, ctx], axis=0))        # (6C, L)
    h = conv(w1_ref, a1) + b1_ref[...] + temb                   # (H, L)
    h = h * jax.nn.sigmoid(h)

    # Layer 2: Conv1d(H -> H) + bias + SiLU.
    h = conv(w2_ref, stack3(h)) + b2_ref[...]                   # (H, L)
    h = h * jax.nn.sigmoid(h)

    # Layer 3: Conv1d(H -> C) + bias -> v_pred.
    v_pred = conv(w3_ref, stack3(h)) + b3_ref[...]              # (C, L)

    # Per-block partial MSE: per-lane sum of squares over channels (lane-dense store);
    # the wrapper finishes the reduction / mean.
    d = v_pred - v_target
    loss_ref[...] = jnp.sum(d * d, axis=0, keepdims=True)       # (1, L)


def _fused_forward(scal, temb, xc, xp, nz, w1, b1, w2, b2, w3, b3):
    B, C, L = xc.shape
    H = b1.shape[0]

    def full(a):  # whole-array block, fetched once (constant block index)
        return pl.BlockSpec(a.shape, lambda b, nd=a.ndim: (0,) * nd)

    grid_spec = pltpu.PrefetchScalarGridSpec(
        num_scalar_prefetch=0,
        grid=(B,),
        in_specs=[
            pl.BlockSpec((None, 3, 1), lambda b: (b, 0, 0)),   # alpha/beta/keep
            pl.BlockSpec((None, H, 1), lambda b: (b, 0, 0)),   # time embedding
            pl.BlockSpec((None, C, L), lambda b: (b, 0, 0)),   # chunk_curr
            pl.BlockSpec((None, C, L), lambda b: (b, 0, 0)),   # chunk_prev
            pl.BlockSpec((None, C, L), lambda b: (b, 0, 0)),   # noise
            full(w1), full(b1), full(w2), full(b2), full(w3), full(b3),
        ],
        out_specs=pl.BlockSpec((None, 1, L), lambda b: (b, 0, 0)),
    )
    per_lane = pl.pallas_call(
        _fused_diffusion_kernel,
        out_shape=jax.ShapeDtypeStruct((B, 1, L), jnp.float32),
        grid_spec=grid_spec,
        compiler_params=pltpu.CompilerParams(
            # Batch blocks are independent -> shard across TensorCores on v7x.
            dimension_semantics=("parallel",),
            # Per-block footprint is a few hundred KiB even at chunk_length=8192,
            # so this leaves large headroom on all of v5e/v6e/v7x.
            vmem_limit_bytes=64 * 1024 * 1024,
        ),
    )(scal, temb, xc, xp, nz, w1, b1, w2, b2, w3, b3)
    return per_lane                                             # (B, 1, L)


# ---------------------------------------------------------------------------------
# Plain-JAX glue: parameters, time embedding, chunk slicing, orchestration
# ---------------------------------------------------------------------------------
def init_params(key, in_channels, hidden, nfreq=8):
    ks = jax.random.split(key, 6)
    c, h = in_channels, hidden
    scale = 0.05
    bf16 = jnp.bfloat16
    # Conv1d(k=3) weights stored MXU-ready: taps stacked along the contraction axis
    # (Cout, 3*Cin) and pre-cast to bf16 once (halves weight DMA/VMEM bytes).
    return dict(
        freqs=jnp.exp(jnp.linspace(0.0, 3.0, nfreq)).astype(jnp.float32),
        t_w1=(jax.random.normal(ks[0], (2 * nfreq, h)) * scale).astype(jnp.float32),
        t_b1=jnp.zeros((h,), jnp.float32),
        t_w2=(jax.random.normal(ks[1], (h, h)) * scale).astype(jnp.float32),
        t_b2=jnp.zeros((h,), jnp.float32),
        w1=(jax.random.normal(ks[2], (h, 3 * 2 * c)) * scale).astype(bf16),
        b1=jnp.zeros((h, 1), jnp.float32),
        w2=(jax.random.normal(ks[3], (h, 3 * h)) * scale).astype(bf16),
        b2=jnp.zeros((h, 1), jnp.float32),
        w3=(jax.random.normal(ks[4], (c, 3 * h)) * scale).astype(bf16),
        b3=jnp.zeros((c, 1), jnp.float32),
    )


def time_embed(params, sigmas):
    # TODO(synk): simplified stand-in for LearnedPositionalEmbedding + time MLP.
    ang = sigmas[:, None] * params["freqs"][None, :] * (2.0 * jnp.pi)
    emb = jnp.concatenate([jnp.sin(ang), jnp.cos(ang)], axis=-1)        # (B, 2*nfreq)
    h = jnp.dot(emb, params["t_w1"]) + params["t_b1"]
    h = jax.nn.gelu(h)
    h = jnp.dot(h, params["t_w2"]) + params["t_b2"]
    return h                                                            # (B, H)


def diffusion_ar1d_forward(params, x, key, *, in_channels, chunk_length, dropout=0.05):
    """x: (B, C, T) in PyTorch NCT layout. Returns the scalar v-diffusion loss."""
    B, C, T = x.shape
    assert C == in_channels
    cl = chunk_length
    num_chunks = T // cl
    assert num_chunks >= 2, "Input tensor length must be >= chunk_length * 2"

    k_idx, k_drop, k_noise, k_sigma = jax.random.split(key, 4)

    # randint(0, num_chunks - 2) inclusive — kept as a traced array (jit-safe, no host sync).
    chunk_index = jax.random.randint(k_idx, (), 0, num_chunks - 1)
    both = jax.lax.dynamic_slice_in_dim(x, cl * chunk_index, 2 * cl, axis=2)
    chunk_prev = both[:, :, :cl]                                        # (B, C, cl)
    chunk_curr = both[:, :, cl:]                                        # (B, C, cl)

    # rand_bool((B,1,1), proba=dropout): True -> zero out the conditioning chunk.
    drop = jax.random.uniform(k_drop, (B,)) < dropout
    keep = 1.0 - drop.astype(jnp.float32)

    # v-diffusion noising coefficients.
    sigmas = jax.random.uniform(k_sigma, (B,), jnp.float32)
    angle = sigmas * (pi / 2.0)
    alpha, beta = jnp.cos(angle), jnp.sin(angle)
    # TODO(synk): noise could be generated in-kernel (pltpu.prng_*) to cut one input
    # stream; kept as jax.random for deterministic, key-driven semantics.
    noise = jax.random.normal(k_noise, (B, C, cl), jnp.float32)

    scal = jnp.stack([alpha, beta, keep], axis=1)[:, :, None]           # (B, 3, 1)
    temb = time_embed(params, sigmas)[:, :, None]                       # (B, H, 1)

    per_lane = _fused_forward(scal, temb, chunk_curr, chunk_prev, noise,
                              params["w1"], params["b1"],
                              params["w2"], params["b2"],
                              params["w3"], params["b3"])
    return jnp.sum(per_lane) / (B * C * cl)                             # mse mean


if __name__ == "__main__":
    key = jax.random.PRNGKey(0)
    k_param, k_x, k_fwd = jax.random.split(key, 3)

    in_channels = 2
    chunk_length = 128    # one chunk == one lane-dense block (multiple of 128)
    total_t = 512         # num_chunks = 4
    batch = 2
    hidden = 32

    params = init_params(k_param, in_channels, hidden)
    x = jax.random.normal(k_x, (batch, in_channels, total_t), jnp.float32)

    fwd = jax.jit(partial(diffusion_ar1d_forward, in_channels=in_channels,
                          chunk_length=chunk_length, dropout=0.05))
    loss = fwd(params, x, k_fwd)
    jax.block_until_ready(loss)
    assert loss.shape == () and bool(jnp.isfinite(loss))
    print("KERNEL_OK")
</pallas_src>

<mosaic_0001>
module attributes {stable_mosaic.version = 11 : i64} {
  func.func @_fused_diffusion_kernel(%arg0: i32, %arg1: memref<1x3x1xf32, #tpu.memory_space<vmem>>, %arg2: memref<1x32x1xf32, #tpu.memory_space<vmem>>, %arg3: memref<1x2x128xf32, #tpu.memory_space<vmem>>, %arg4: memref<1x2x128xf32, #tpu.memory_space<vmem>>, %arg5: memref<1x2x128xf32, #tpu.memory_space<vmem>>, %arg6: memref<32x12xbf16, #tpu.memory_space<vmem>>, %arg7: memref<32x1xf32, #tpu.memory_space<vmem>>, %arg8: memref<32x96xbf16, #tpu.memory_space<vmem>>, %arg9: memref<32x1xf32, #tpu.memory_space<vmem>>, %arg10: memref<2x96xbf16, #tpu.memory_space<vmem>>, %arg11: memref<2x1xf32, #tpu.memory_space<vmem>>, %arg12: memref<1x1x128xf32, #tpu.memory_space<vmem>>) attributes {dimension_semantics = [#tpu.dimension_semantics<parallel>], iteration_bounds = array<i64: 2>, scalar_prefetch = 0 : i64, scratch_operands = 0 : i64, tpu.core_type = #tpu.core_type<tc>, window_params = [{transform_indices = @transform_0, window_bounds = array<i64: 1, 3, 1>}, {transform_indices = @transform_1, window_bounds = array<i64: 1, 32, 1>}, {transform_indices = @transform_2, window_bounds = array<i64: 1, 2, 128>}, {transform_indices = @transform_3, window_bounds = array<i64: 1, 2, 128>}, {transform_indices = @transform_4, window_bounds = array<i64: 1, 2, 128>}, {pipeline_mode = #tpu.pipeline_mode<synchronous>, transform_indices = @transform_5, window_bounds = array<i64: 32, 12>}, {pipeline_mode = #tpu.pipeline_mode<synchronous>, transform_indices = @transform_6, window_bounds = array<i64: 32, 1>}, {pipeline_mode = #tpu.pipeline_mode<synchronous>, transform_indices = @transform_7, window_bounds = array<i64: 32, 96>}, {pipeline_mode = #tpu.pipeline_mode<synchronous>, transform_indices = @transform_8, window_bounds = array<i64: 32, 1>}, {pipeline_mode = #tpu.pipeline_mode<synchronous>, transform_indices = @transform_9, window_bounds = array<i64: 2, 96>}, {pipeline_mode = #tpu.pipeline_mode<synchronous>, transform_indices = @transform_10, window_bounds = array<i64: 2, 1>}, {transform_indices = @transform_11, window_bounds = array<i64: 1, 1, 128>}]} {
    %c0 = arith.constant 0 : index
    %c0_0 = arith.constant 0 : index
    %c0_1 = arith.constant 0 : index
    %0 = vector.load %arg3[%c0, %c0_0, %c0_1] : memref<1x2x128xf32, #tpu.memory_space<vmem>>, vector<1x2x128xf32>
    %1 = vector.shape_cast %0 : vector<1x2x128xf32> to vector<2x128xf32>
    %c0_2 = arith.constant 0 : index
    %c0_3 = arith.constant 0 : index
    %c0_4 = arith.constant 0 : index
    %2 = vector.load %arg4[%c0_2, %c0_3, %c0_4] : memref<1x2x128xf32, #tpu.memory_space<vmem>>, vector<1x2x128xf32>
    %3 = vector.shape_cast %2 : vector<1x2x128xf32> to vector<2x128xf32>
    %c0_5 = arith.constant 0 : index
    %c0_6 = arith.constant 0 : index
    %c0_7 = arith.constant 0 : index
    %4 = vector.load %arg5[%c0_5, %c0_6, %c0_7] : memref<1x2x128xf32, #tpu.memory_space<vmem>>, vector<1x2x128xf32>
    %5 = vector.shape_cast %4 : vector<1x2x128xf32> to vector<2x128xf32>
    %c0_8 = arith.constant 0 : index
    %c0_9 = arith.constant 0 : index
    %c0_10 = arith.constant 0 : index
    %6 = vector.load %arg2[%c0_8, %c0_9, %c0_10] : memref<1x32x1xf32, #tpu.memory_space<vmem>>, vector<1x32x1xf32>
    %7 = vector.shape_cast %6 : vector<1x32x1xf32> to vector<32x1xf32>
    %c0_11 = arith.constant 0 : index
    %c0_12 = arith.constant 0 : index
    %c0_13 = arith.constant 0 : index
    %8 = vector.load %arg1[%c0_11, %c0_12, %c0_13] : memref<1x3x1xf32, #tpu.memory_space<vmem>>, vector<1x3x1xf32>
    %9 = vector.shape_cast %8 : vector<1x3x1xf32> to vector<3x1xf32>
    %10 = vector.extract_strided_slice %9 {offsets = [0, 0], sizes = [1, 1], strides = [1, 1]} : vector<3x1xf32> to vector<1x1xf32>
    %11 = vector.extract_strided_slice %9 {offsets = [1, 0], sizes = [1, 1], strides = [1, 1]} : vector<3x1xf32> to vector<1x1xf32>
    %12 = vector.extract_strided_slice %9 {offsets = [2, 0], sizes = [1, 1], strides = [1, 1]} : vector<3x1xf32> to vector<1x1xf32>
    %13 = tpu.iota {dimensions = array<i32: 1>} : vector<1x128xi32>
    %c0_i32 = arith.constant 0 : i32
    %14 = vector.broadcast %c0_i32 : i32 to vector<1x128xi32>
    %15 = arith.cmpi sgt, %13, %14 : vector<1x128xi32>
    %16 = arith.extui %15 : vector<1x128xi1> to vector<1x128xi32>
    %17 = arith.sitofp %16 : vector<1x128xi32> to vector<1x128xf32>
    %c127_i32 = arith.constant 127 : i32
    %18 = vector.broadcast %c127_i32 : i32 to vector<1x128xi32>
    %19 = arith.cmpi slt, %13, %18 : vector<1x128xi32>
    %20 = arith.extui %19 : vector<1x128xi1> to vector<1x128xi32>
    %21 = arith.sitofp %20 : vector<1x128xi32> to vector<1x128xf32>
    %22 = vector.broadcast %10 : vector<1x1xf32> to vector<2x128xf32>
    %23 = arith.mulf %22, %1 : vector<2x128xf32>
    %24 = vector.broadcast %11 : vector<1x1xf32> to vector<2x128xf32>
    %25 = arith.mulf %24, %5 : vector<2x128xf32>
    %26 = arith.addf %23, %25 : vector<2x128xf32>
    %27 = vector.broadcast %10 : vector<1x1xf32> to vector<2x128xf32>
    %28 = arith.mulf %27, %5 : vector<2x128xf32>
    %29 = vector.broadcast %11 : vector<1x1xf32> to vector<2x128xf32>
    %30 = arith.mulf %29, %1 : vector<2x128xf32>
    %31 = arith.subf %28, %30 : vector<2x128xf32>
    %32 = vector.broadcast %12 : vector<1x1xf32> to vector<2x128xf32>
    %33 = arith.mulf %32, %3 : vector<2x128xf32>
    %34 = tpu.concatenate %26, %33 in 0 : vector<2x128xf32>, vector<2x128xf32> -> vector<4x128xf32>
    %c1_i32 = arith.constant 1 : i32
    %35 = tpu.dynamic_rotate %34 by %c1_i32 dim 1 : vector<4x128xf32>, i32 -> vector<4x128xf32>
    %36 = vector.broadcast %17 : vector<1x128xf32> to vector<4x128xf32>
    %37 = arith.mulf %35, %36 : vector<4x128xf32>
    %c127_i32_14 = arith.constant 127 : i32
    %38 = tpu.dynamic_rotate %34 by %c127_i32_14 dim 1 : vector<4x128xf32>, i32 -> vector<4x128xf32>
    %39 = vector.broadcast %21 : vector<1x128xf32> to vector<4x128xf32>
    %40 = arith.mulf %38, %39 : vector<4x128xf32>
    %41 = tpu.concatenate %37, %34, %40 in 0 : vector<4x128xf32>, vector<4x128xf32>, vector<4x128xf32> -> vector<12x128xf32>
    %c0_15 = arith.constant 0 : index
    %c0_16 = arith.constant 0 : index
    %42 = vector.load %arg6[%c0_15, %c0_16] : memref<32x12xbf16, #tpu.memory_space<vmem>>, vector<32x12xbf16>
    %43 = arith.truncf %41 : vector<12x128xf32> to vector<12x128xbf16>
    %cst = arith.constant dense<0.000000e+00> : vector<32x128xf32>
    %44 = tpu.matmul %42, %43, %cst {dimension_numbers = #tpu.dot_dimension_numbers<[1], [0], [0], [1], [0, 0, 1, 1], [], []>} : vector<32x12xbf16>, vector<12x128xbf16>, vector<32x128xf32> -> vector<32x128xf32>
    %c0_17 = arith.constant 0 : index
    %c0_18 = arith.constant 0 : index
    %45 = vector.load %arg7[%c0_17, %c0_18] : memref<32x1xf32, #tpu.memory_space<vmem>>, vector<32x1xf32>
    %46 = vector.broadcast %45 : vector<32x1xf32> to vector<32x128xf32>
    %47 = arith.addf %44, %46 : vector<32x128xf32>
    %48 = vector.broadcast %7 : vector<32x1xf32> to vector<32x128xf32>
    %49 = arith.addf %47, %48 : vector<32x128xf32>
    %50 = arith.negf %49 : vector<32x128xf32>
    %51 = math.exp %50 : vector<32x128xf32>
    %cst_19 = arith.constant 1.000000e+00 : f32
    %52 = vector.broadcast %cst_19 : f32 to vector<32x128xf32>
    %53 = arith.addf %52, %51 : vector<32x128xf32>
    %54 = arith.divf %52, %53 : vector<32x128xf32>
    %55 = arith.mulf %49, %54 : vector<32x128xf32>
    %c1_i32_20 = arith.constant 1 : i32
    %56 = tpu.dynamic_rotate %55 by %c1_i32_20 dim 1 : vector<32x128xf32>, i32 -> vector<32x128xf32>
    %57 = vector.broadcast %17 : vector<1x128xf32> to vector<32x128xf32>
    %58 = arith.mulf %56, %57 : vector<32x128xf32>
    %c127_i32_21 = arith.constant 127 : i32
    %59 = tpu.dynamic_rotate %55 by %c127_i32_21 dim 1 : vector<32x128xf32>, i32 -> vector<32x128xf32>
    %60 = vector.broadcast %21 : vector<1x128xf32> to vector<32x128xf32>
    %61 = arith.mulf %59, %60 : vector<32x128xf32>
    %62 = tpu.concatenate %58, %55, %61 in 0 : vector<32x128xf32>, vector<32x128xf32>, vector<32x128xf32> -> vector<96x128xf32>
    %c0_22 = arith.constant 0 : index
    %c0_23 = arith.constant 0 : index
    %63 = vector.load %arg8[%c0_22, %c0_23] : memref<32x96xbf16, #tpu.memory_space<vmem>>, vector<32x96xbf16>
    %64 = arith.truncf %62 : vector<96x128xf32> to vector<96x128xbf16>
    %cst_24 = arith.constant dense<0.000000e+00> : vector<32x128xf32>
    %65 = tpu.matmul %63, %64, %cst_24 {dimension_numbers = #tpu.dot_dimension_numbers<[1], [0], [0], [1], [0, 0, 1, 1], [], []>} : vector<32x96xbf16>, vector<96x128xbf16>, vector<32x128xf32> -> vector<32x128xf32>
    %c0_25 = arith.constant 0 : index
    %c0_26 = arith.constant 0 : index
    %66 = vector.load %arg9[%c0_25, %c0_26] : memref<32x1xf32, #tpu.memory_space<vmem>>, vector<32x1xf32>
    %67 = vector.broadcast %66 : vector<32x1xf32> to vector<32x128xf32>
    %68 = arith.addf %65, %67 : vector<32x128xf32>
    %69 = arith.negf %68 : vector<32x128xf32>
    %70 = math.exp %69 : vector<32x128xf32>
    %cst_27 = arith.constant 1.000000e+00 : f32
    %71 = vector.broadcast %cst_27 : f32 to vector<32x128xf32>
    %72 = arith.addf %71, %70 : vector<32x128xf32>
    %73 = arith.divf %71, %72 : vector<32x128xf32>
    %74 = arith.mulf %68, %73 : vector<32x128xf32>
    %c1_i32_28 = arith.constant 1 : i32
    %75 = tpu.dynamic_rotate %74 by %c1_i32_28 dim 1 : vector<32x128xf32>, i32 -> vector<32x128xf32>
    %76 = vector.broadcast %17 : vector<1x128xf32> to vector<32x128xf32>
    %77 = arith.mulf %75, %76 : vector<32x128xf32>
    %c127_i32_29 = arith.constant 127 : i32
    %78 = tpu.dynamic_rotate %74 by %c127_i32_29 dim 1 : vector<32x128xf32>, i32 -> vector<32x128xf32>
    %79 = vector.broadcast %21 : vector<1x128xf32> to vector<32x128xf32>
    %80 = arith.mulf %78, %79 : vector<32x128xf32>
    %81 = tpu.concatenate %77, %74, %80 in 0 : vector<32x128xf32>, vector<32x128xf32>, vector<32x128xf32> -> vector<96x128xf32>
    %c0_30 = arith.constant 0 : index
    %c0_31 = arith.constant 0 : index
    %82 = vector.load %arg10[%c0_30, %c0_31] : memref<2x96xbf16, #tpu.memory_space<vmem>>, vector<2x96xbf16>
    %83 = arith.truncf %81 : vector<96x128xf32> to vector<96x128xbf16>
    %cst_32 = arith.constant dense<0.000000e+00> : vector<2x128xf32>
    %84 = tpu.matmul %82, %83, %cst_32 {dimension_numbers = #tpu.dot_dimension_numbers<[1], [0], [0], [1], [0, 0, 1, 1], [], []>} : vector<2x96xbf16>, vector<96x128xbf16>, vector<2x128xf32> -> vector<2x128xf32>
    %c0_33 = arith.constant 0 : index
    %c0_34 = arith.constant 0 : index
    %85 = vector.load %arg11[%c0_33, %c0_34] : memref<2x1xf32, #tpu.memory_space<vmem>>, vector<2x1xf32>
    %86 = vector.broadcast %85 : vector<2x1xf32> to vector<2x128xf32>
    %87 = arith.addf %84, %86 : vector<2x128xf32>
    %88 = arith.subf %87, %31 : vector<2x128xf32>
    %89 = arith.mulf %88, %88 : vector<2x128xf32>
    %cst_35 = arith.constant dense<0.000000e+00> : vector<128xf32>
    %90 = vector.multi_reduction <add>, %89, %cst_35 [0] : vector<2x128xf32> to vector<128xf32>
    %91 = vector.shape_cast %90 : vector<128xf32> to vector<1x128xf32>
    %c0_36 = arith.constant 0 : index
    %c0_37 = arith.constant 0 : index
    %c0_38 = arith.constant 0 : index
    %92 = vector.load %arg12[%c0_36, %c0_37, %c0_38] : memref<1x1x128xf32, #tpu.memory_space<vmem>>, vector<1x1x128xf32>
    %93 = vector.shape_cast %92 : vector<1x1x128xf32> to vector<1x128xf32>
    %94 = vector.shape_cast %91 : vector<1x128xf32> to vector<1x1x128xf32>
    tpu.vector_store %arg12[%c0_36, %c0_37, %c0_38], %94 {strides = array<i32>} : memref<1x1x128xf32, #tpu.memory_space<vmem>>, vector<1x1x128xf32>,
    return
  }
  func.func @transform_0(%arg0: i32) -> (i32, i32, i32) {
    %c0_i32 = arith.constant 0 : i32
    %c0_i32_0 = arith.constant 0 : i32
    %c0_i32_1 = arith.constant 0 : i32
    return %arg0, %c0_i32, %c0_i32_0 : i32, i32, i32
  }
  func.func @transform_1(%arg0: i32) -> (i32, i32, i32) {
    %c0_i32 = arith.constant 0 : i32
    %c0_i32_0 = arith.constant 0 : i32
    %c0_i32_1 = arith.constant 0 : i32
    return %arg0, %c0_i32, %c0_i32_0 : i32, i32, i32
  }
  func.func @transform_2(%arg0: i32) -> (i32, i32, i32) {
    %c0_i32 = arith.constant 0 : i32
    %c0_i32_0 = arith.constant 0 : i32
    %c0_i32_1 = arith.constant 0 : i32
    return %arg0, %c0_i32, %c0_i32_0 : i32, i32, i32
  }
  func.func @transform_3(%arg0: i32) -> (i32, i32, i32) {
    %c0_i32 = arith.constant 0 : i32
    %c0_i32_0 = arith.constant 0 : i32
    %c0_i32_1 = arith.constant 0 : i32
    return %arg0, %c0_i32, %c0_i32_0 : i32, i32, i32
  }
  func.func @transform_4(%arg0: i32) -> (i32, i32, i32) {
    %c0_i32 = arith.constant 0 : i32
    %c0_i32_0 = arith.constant 0 : i32
    %c0_i32_1 = arith.constant 0 : i32
    return %arg0, %c0_i32, %c0_i32_0 : i32, i32, i32
  }
  func.func @transform_5(%arg0: i32) -> (i32, i32) {
    %c0_i32 = arith.constant 0 : i32
    %c0_i32_0 = arith.constant 0 : i32
    %c0_i32_1 = arith.constant 0 : i32
    return %c0_i32, %c0_i32_0 : i32, i32
  }
  func.func @transform_6(%arg0: i32) -> (i32, i32) {
    %c0_i32 = arith.constant 0 : i32
    %c0_i32_0 = arith.constant 0 : i32
    %c0_i32_1 = arith.constant 0 : i32
    return %c0_i32, %c0_i32_0 : i32, i32
  }
  func.func @transform_7(%arg0: i32) -> (i32, i32) {
    %c0_i32 = arith.constant 0 : i32
    %c0_i32_0 = arith.constant 0 : i32
    %c0_i32_1 = arith.constant 0 : i32
    return %c0_i32, %c0_i32_0 : i32, i32
  }
  func.func @transform_8(%arg0: i32) -> (i32, i32) {
    %c0_i32 = arith.constant 0 : i32
    %c0_i32_0 = arith.constant 0 : i32
    %c0_i32_1 = arith.constant 0 : i32
    return %c0_i32, %c0_i32_0 : i32, i32
  }
  func.func @transform_9(%arg0: i32) -> (i32, i32) {
    %c0_i32 = arith.constant 0 : i32
    %c0_i32_0 = arith.constant 0 : i32
    %c0_i32_1 = arith.constant 0 : i32
    return %c0_i32, %c0_i32_0 : i32, i32
  }
  func.func @transform_10(%arg0: i32) -> (i32, i32) {
    %c0_i32 = arith.constant 0 : i32
    %c0_i32_0 = arith.constant 0 : i32
    %c0_i32_1 = arith.constant 0 : i32
    return %c0_i32, %c0_i32_0 : i32, i32
  }
  func.func @transform_11(%arg0: i32) -> (i32, i32, i32) {
    %c0_i32 = arith.constant 0 : i32
    %c0_i32_0 = arith.constant 0 : i32
    %c0_i32_1 = arith.constant 0 : i32
    return %arg0, %c0_i32, %c0_i32_0 : i32, i32, i32
  }
}

</mosaic_0001>

<bundles_post_ra>
// kernel: diffusion_ar1d_forward.3
= control target key start
LH: loop header
LB: loop body
LE: loop exit
PB: predicated region body
PF: predicated region fallthrough
CT: control target
= control target key end

     0   :  { %s1188_s17 = smov 0   ;;  %s1344_s0 = inlined_call_operand.vmem [shape: f32[2,3,1], index: 0, kind: input, shape index: {}]   ;;  %s1345_s1 = inlined_call_operand.vmem [shape: f32[2,32,1], index: 1, kind: input, shape index: {}]   ;;  %s1346_s2 = inlined_call_operand.vmem [shape: f32[2,2,128], index: 2, kind: input, shape index: {}]   ;;  %s1347_s3 = inlined_call_operand.vmem [shape: f32[2,2,128], index: 3, kind: input, shape index: {}]   ;;  %s1348_s4 = inlined_call_operand.vmem [shape: f32[2,2,128], index: 4, kind: input, shape index: {}]   ;;  %s1349_s5 = inlined_call_operand.vmem [shape: bf16[32,12], index: 5, kind: input, shape index: {}]   ;;  %s1350_s6 = inlined_call_operand.vmem [shape: f32[32,1], index: 6, kind: input, shape index: {}]   ;;  %s1351_s7 = inlined_call_operand.vmem [shape: bf16[32,96], index: 7, kind: input, shape index: {}]   ;;  %s1352_s8 = inlined_call_operand.vmem [shape: f32[32,1], index: 8, kind: input, shape index: {}]   ;;  %s1353_s9 = inlined_call_operand.vmem [shape: bf16[2,96], index: 9, kind: input, shape index: {}]   ;;  %s1354_s10 = inlined_call_operand.vmem [shape: f32[2,1], index: 10, kind: input, shape index: {}]   ;;  %s1355_s11 = inlined_call_operand.vmem [shape: f32[2,1,128], index: 11, kind: output, shape index: {}]  }
   0x1 LB: > { %s1008_s18 = sadd.s32 4294967295, %s1122_s17   ;;  %p1012_p0 = scmp.ge.s32.totalorder %s1122_s17, 1  ;;  %s1122_s17 = sphi %s1188_s17, %s21_s17  }
   0x2   : > { %p373_p1 = scmp.lt.s32.totalorder %s1122_s17, 3 }
   0x4   : > { %p374_p2 = pnand %p1012_p0, %p373_p1 }
   0x5   : > { %p427_p3 = scmp.lt.s32.totalorder (!%p374_p2), %s1008_s18, 1  ;;  %s1125_s20 = smov (!%p374_p2), 127  }
   0x6   : > { %377 = sbr.rel (%p374_p2) target bundleno = 997 (0x3e5), region = 64 }
   0xb   : > { %s1357_s18 = smov (!%p427_p3, %s1008_s18), 1  ;;  %vm490_vm0 = vcmask 1041408   ;;  %v510_v18 = vld [vmem:[%s1350_s6 + $0x10] sm:$0xff]  ;;  %v1126_v19 = vmov 0   ;;  %v511_v20 = vld [vmem:[%s1350_s6 + $0x18] sm:$0xff]  ;;  %v508_v21 = vld [vmem:[%s1350_s6] sm:$0xff]  ;;  %v460_v22 = vlaneseq }
   0xc   : > { %s1013_s19 = sshll.u32 %s1357_s18, 2  ;;  %s1016_s23 = sshll.u32 %s1357_s18, 1  ;;  %1081 = vset.pattern.permute.xlu1 %v1126_v19  ;;  %1083 = vset.pattern.permute.xlu0 %v1126_v19  ;;  %v509_v23 = vld [vmem:[%s1350_s6 + $0x8] sm:$0xff]  ;;  %v1127_v28 = vmov 0.0   ;;  %vm501_vm3 = vcmask 1043456   ;;  %vm549_vm4 = vcmask 1045504  }
   0xd   : > { %s430_s22 = scalar_lea.vmem %s1344_s0, %s1013_s19  ;;  %s439_s26 = scalar_lea.vmem %s1346_s2, %s1016_s23  ;;  %524 = vperm.xlu1 %1081, %v510_v18   ;;  %1082 = vset.pattern.permute.xlu2 %v1126_v19  ;;  %v461_v24 = vand.u32 127, %v460_v22  ;;  %v1053_v39 = vld [vmem:[%s1349_s5] sm:$0xff]  ;;  %vm542_vm5 = vcmask 97280   ;;  %v1054_v41 = vld [vmem:[%s1349_s5 + $0x8] sm:$0xff] }
   0xe   : > { %v459_v0 = vld [vmem:[%s430_s22] sm:$0x7]  ;;  %s447_s29 = scalar_lea.vmem %s1348_s4, %s1016_s23  ;;  %s443_s13 = scalar_lea.vmem %s1347_s3, %s1016_s23 }
   0xf   : > { %1063 = vpush %v459_v0  ;;  %v473_v1 = vrot.slane %v459_v0, 1  ;;  %v482_v2 = vrot.slane %v459_v0, 2  ;;  %v452_v3 = vld [vmem:[%s439_s26] sm:$0x3]  ;;  %s1124_s19 = smov 1   ;;  %vm462_vm1 = vcmp.gt.s32.totalorder %v461_v24, 0  ;;  %s450_s23 = scalar_lea.vmem %s1355_s11, %s1357_s18 }
  0x10   : > { %v454_v4 = vld [vmem:[%s447_s29] sm:$0x3]  ;;  %s1052_s29 = sshll.u32 %s1357_s18, 5  ;;  %v1237_v29 = vsel %vm462_vm1, 1.0, %v1127_v28  ;;  %vm465_vm2 = vcmp.lt.s32.totalorder %v461_v24, 127 }
  0x11   : > { %1065 = vpush %v473_v1  ;;  %v453_v8 = vld [vmem:[%s443_s13] sm:$0x3]  ;;  %s435_s13 = scalar_lea.vmem %s1345_s1, %s1052_s29  ;;  %v1240_v31 = vsel %vm465_vm2, 1.0, %v1127_v28 }
  0x12   : > { %1067 = vpush %v482_v2  ;;  %v457_v26 = vld [vmem:[%s435_s13 + $0x10] sm:$0xff]  ;;  %v456_v27 = vld [vmem:[%s435_s13 + $0x8] sm:$0xff]  ;;  %v458_v32 = vld [vmem:[%s435_s13 + $0x18] sm:$0xff] }
  0x13   : > { %584 = vperm.xlu2 %1082, %v457_v26   ;;  %v455_v40 = vld [vmem:[%s435_s13] sm:$0xff] }
  0x15   : > { %529 = vperm.xlu1 %1081, %v511_v20  }
  0x1b   : > { %589 = vperm.xlu2 %1082, %v458_v32  }
  0x1d   : > { %519 = vperm.xlu1 %1081, %v509_v23  }
  0x23   : > { %574 = vperm.xlu2 %1082, %v455_v40  }
  0x25   : > { %579 = vperm.xlu1 %1081, %v456_v27  }
  0x40   : > { %s1064_s14 = spop %1063 }
  0x41   : > { %v470_v5 = vstv %s1064_s14 }
  0x42   : > { %v472_v6 = vmul.f32 %v470_v5, %v452_v3  ;;  %v1212_v7 = vmul.f32 %v470_v5, %v454_v4  ;;  %s1066_s15 = spop %1065 }
  0x43   : > { %v475_v9 = vstv %s1066_s15  ;;  %s1068_s16 = spop %1067 }
  0x44   : > { %v477_v10 = vmul.f32 %v475_v9, %v454_v4  ;;  %v1214_v11 = vmul.f32 %v475_v9, %v452_v3  ;;  %v484_v12 = vstv %s1068_s16 }
  0x45   : > { %v486_v13 = vmul.f32 %v484_v12, %v453_v8 }
  0x46   : > { %v478_v14 = vadd.f32 %v477_v10, %v472_v6  ;;  %v481_v15 = vsub.f32 %v1212_v7, %v1214_v11 }
  0x47   : > { %v488_v16 = vrot.slane %v486_v13, 6 }
  0x49   : > { %v491_v17 = vsel %vm490_vm0, %v478_v14, %v488_v16 }
  0x4a   : > { %492 = vrot.lane.b32.xlu0 %v491_v17, %s1124_s19  ;;  %v499_v33 = vrot.slane %v491_v17, 4 }
  0x52   : > { %495 = vrot.lane.b32.xlu0 %v491_v17, %s1125_s20 }
  0x5a   : > { %514 = vperm.xlu0 %1083, %v508_v21  }
  0x6d   : > { %v585_v43 = vpop.permute.xlu2 %584 }
  0x75   : > { %v590_v45 = vpop.permute.xlu2 %589 }
  0x7d   : > { %v575_v49 = vpop.permute.xlu2 %574 }
  0x7f   : > { %v525_v42 = vpop.permute.xlu1 %524 }
  0x87   : > { %v530_v44 = vpop.permute.xlu1 %529 }
  0x8f   : > { %v520_v47 = vpop.permute.xlu1 %519 }
  0x97   : > { %v580_v54 = vpop.permute.xlu1 %579 }
  0xbc   : > { %v493_v25 = vpop.permute.xlu0 %492 }
  0xbd   : > { %v494_v30 = vmul.f32 %v1237_v29, %v493_v25 }
  0xbf   : > { %v502_v36 = vsel %vm501_vm3, %v494_v30, %v499_v33 }
  0xc4   : > { %v496_v34 = vpop.permute.xlu0 %495 }
  0xc5   : > { %v497_v35 = vmul.f32 %v1240_v31, %v496_v34 }
  0xc7   : > { %v507_v37 = vpack.c.bf16 %v497_v35, %v502_v36 }
  0xc9   : > { %v551_v38 = vsel %vm549_vm4, %v507_v37, 0 }
  0xca   : > { %560 = vmatpush.bf16.msra.mxu0 %v551_v38 }
  0xcc   : > { %v515_v46 = vpop.permute.xlu0 %514 }
  0xcd   : > { %1029 = vmatmul.msk.bf16.vlgmr.msra.gmra.mxu0 %vm542_vm5, %v1053_v39 }
  0xdd   : > { %1030 = vmatmul.msk.bf16.gmra.mxu0 %vm542_vm5, %v1054_v41 }
 0x14a   : > { %v562_v48 = vpop.f32.mrf.mxu0 }
 0x14b   : > { %v563_v50 = vadd.f32 %v562_v48, %v515_v46 }
 0x14d   : > { %v592_v51 = vadd.f32 %v575_v49, %v563_v50 }
 0x14f   : > { %v1031_v52 = vmul.f32 -1.442695, %v592_v51 }
 0x151   : > { %1084 = vpow2.f32 %v1031_v52 }
 0x152   : > { %v564_v53 = vpop.f32.mrf.mxu0 }
 0x153   : > { %v565_v55 = vadd.f32 %v564_v53, %v520_v47 }
 0x155   : > { %v593_v56 = vadd.f32 %v580_v54, %v565_v55 }
 0x157   : > { %v1085_v57 = vpop.eup %1084  ;;  %v1032_v58 = vmul.f32 -1.442695, %v593_v56 }
 0x158   : > { %v608_v59 = vadd.f32 1.0, %v1085_v57 }
 0x159   : > { %1086 = vpow2.f32 %v1032_v58 }
 0x15a   : > { %1088 = vrcp.f32 %v608_v59  ;;  %v567_v60 = vpop.f32.mrf.mxu0  ;;  %v623_v8 = vand.u32 2147483648, %v608_v59  ;;  %v621_v10 = vand.u32 2147483647, %v608_v59  ;;  %vm617_vm7 = vweird.f32 %v608_v59 }
 0x15b   : > { %v568_v61 = vadd.f32 %v567_v60, %v525_v42 }
 0x15c   : > { %v624_v18 = vor.u32 1.1754944e-38, %v623_v8  ;;  %vm622_vm9 = vcmp.eq.f32.partialorder %v621_v10, 8.507059e+37 }
 0x15d   : > { %v1249_v62 = vadd.f32 %v585_v43, %v568_v61  ;;  %v712_v61 = vld [vmem:[%s1352_s8 + $0x10] sm:$0xff] }
 0x15f   : > { %v1087_v63 = vpop.eup %1086  ;;  %v1033_v0 = vmul.f32 -1.442695, %v1249_v62 }
 0x160   : > { %v1089_v1 = vpop.eup %1088  ;;  %v609_v2 = vadd.f32 1.0, %v1087_v63  ;;  %v711_v63 = vld [vmem:[%s1352_s8 + $0x8] sm:$0xff] }
 0x161   : > { %v613_v3 = vmul.f32 %v1089_v1, %v608_v59  ;;  %1090 = vpow2.f32 %v1033_v0  ;;  %vm618_vm6 = vweird.f32 %v1089_v1  ;;  %v710_v0 = vld [vmem:[%s1352_s8] sm:$0xff] }
 0x162   : > { %1092 = vrcp.f32 %v609_v2  ;;  %v569_v4 = vpop.f32.mrf.mxu0  ;;  %vm619_vm8 = vmor %vm617_vm7, %vm618_vm6  ;;  %v638_v25 = vand.u32 2147483648, %v609_v2  ;;  %v636_v27 = vand.u32 2147483647, %v609_v2  ;;  %vm632_vm11 = vweird.f32 %v609_v2 }
 0x163   : > { %v614_v5 = vsub.f32 1.0, %v613_v3  ;;  %v570_v6 = vadd.f32 %v569_v4, %v530_v44  ;;  %vm744_vm7 = vcmask 785408  }
 0x164   : > { %v639_v33 = vor.u32 1.1754944e-38, %v638_v25  ;;  %vm637_vm13 = vcmp.eq.f32.partialorder %v636_v27, 8.507059e+37  ;;  %v1056_v25 = vld [vmem:[%s1351_s7 + $0x8] sm:$0xff] }
 0x165   : > { %v615_v9 = vmul.f32 %v1089_v1, %v614_v5  ;;  %v1252_v12 = vadd.f32 %v590_v45, %v570_v6 }
 0x167   : > { %v1091_v13 = vpop.eup %1090  ;;  %v616_v14 = vadd.f32 %v1089_v1, %v615_v9  ;;  %v1034_v16 = vmul.f32 -1.442695, %v1252_v12 }
 0x168   : > { %v1093_v17 = vpop.eup %1092  ;;  %v610_v19 = vadd.f32 1.0, %v1091_v13 }
 0x169   : > { %v620_v20 = vsel %vm619_vm8, %v1089_v1, %v616_v14  ;;  %v628_v21 = vmul.f32 %v1093_v17, %v609_v2  ;;  %1094 = vpow2.f32 %v1034_v16  ;;  %vm633_vm10 = vweird.f32 %v1093_v17 }
 0x16a   : > { %v625_v22 = vsel %vm622_vm9, %v624_v18, %v620_v20  ;;  %1096 = vrcp.f32 %v610_v19  ;;  %vm634_vm12 = vmor %vm632_vm11, %vm633_vm10  ;;  %v653_v40 = vand.u32 2147483648, %v610_v19  ;;  %v651_v42 = vand.u32 2147483647, %v610_v19 }
 0x16b   : > { %v672_v23 = vmul.f32 %v625_v22, %v592_v51  ;;  %v629_v24 = vsub.f32 1.0, %v628_v21  ;;  %vm647_vm15 = vweird.f32 %v610_v19 }
 0x16c   : > { %v654_v46 = vor.u32 1.1754944e-38, %v653_v40  ;;  %vm652_vm2 = vcmp.eq.f32.partialorder %v651_v42, 8.507059e+37 }
 0x16d   : > { %v630_v26 = vmul.f32 %v1093_v17, %v629_v24  ;;  %688 = vrot.lane.b32.xlu1 %v672_v23, %s1125_s20  ;;  %v1055_v24 = vld [vmem:[%s1351_s7] sm:$0xff] }
 0x16f   : > { %v1095_v28 = vpop.eup %1094  ;;  %v631_v30 = vadd.f32 %v1093_v17, %v630_v26 }
 0x170   : > { %v1097_v32 = vpop.eup %1096  ;;  %v611_v34 = vadd.f32 1.0, %v1095_v28 }
 0x171   : > { %v635_v35 = vsel %vm634_vm12, %v1093_v17, %v631_v30  ;;  %v643_v36 = vmul.f32 %v1097_v32, %v610_v19  ;;  %vm648_vm14 = vweird.f32 %v1097_v32 }
 0x172   : > { %v640_v37 = vsel %vm637_vm13, %v639_v33, %v635_v35  ;;  %1098 = vrcp.f32 %v611_v34  ;;  %vm649_vm1 = vmor %vm647_vm15, %vm648_vm14  ;;  %v668_v52 = vand.u32 2147483648, %v611_v34  ;;  %v666_v54 = vand.u32 2147483647, %v611_v34 }
 0x173   : > { %v673_v38 = vmul.f32 %v640_v37, %v593_v56  ;;  %v644_v39 = vsub.f32 1.0, %v643_v36  ;;  %vm662_vm4 = vweird.f32 %v611_v34 }
 0x174   : > { %v669_v56 = vor.u32 1.1754944e-38, %v668_v52  ;;  %vm667_vm6 = vcmp.eq.f32.partialorder %v666_v54, 8.507059e+37 }
 0x175   : > { %v645_v41 = vmul.f32 %v1097_v32, %v644_v39  ;;  %v706_v43 = vpack.c.bf16 %v673_v38, %v672_v23 }
 0x177   : > { %v646_v44 = vadd.f32 %v1097_v32, %v645_v41 }
 0x178   : > { %v1099_v45 = vpop.eup %1098 }
 0x179   : > { %v650_v47 = vsel %vm649_vm1, %v1097_v32, %v646_v44  ;;  %v658_v48 = vmul.f32 %v1099_v45, %v611_v34  ;;  %vm663_vm3 = vweird.f32 %v1099_v45 }
 0x17a   : > { %v655_v49 = vsel %vm652_vm2, %v654_v46, %v650_v47  ;;  %vm664_vm5 = vmor %vm662_vm4, %vm663_vm3 }
 0x17b   : > { %v674_v50 = vmul.f32 %v655_v49, %v1249_v62  ;;  %v659_v51 = vsub.f32 1.0, %v658_v48  ;;  %v713_v62 = vld [vmem:[%s1352_s8 + $0x18] sm:$0xff] }
 0x17d   : > { %692 = vrot.lane.b32.xlu2 %v674_v50, %s1125_s20  ;;  %v660_v53 = vmul.f32 %v1099_v45, %v659_v51 }
 0x17f   : > { %v661_v55 = vadd.f32 %v1099_v45, %v660_v53 }
 0x181   : > { %v665_v57 = vsel %vm664_vm5, %v1099_v45, %v661_v55 }
 0x182   : > { %v670_v58 = vsel %vm667_vm6, %v669_v56, %v665_v57 }
 0x183   : > { %v675_v59 = vmul.f32 %v670_v58, %v1252_v12 }
 0x185   : > { %694 = vrot.lane.b32.xlu0 %v675_v59, %s1125_s20  ;;  %690 = vrot.lane.b32.xlu2 %v673_v38, %s1125_s20  ;;  %v707_v60 = vpack.c.bf16 %v675_v59, %v674_v50 }
 0x186   : > { %682 = vrot.lane.b32.xlu1 %v675_v59, %s1124_s19 }
 0x18d   : > { %680 = vrot.lane.b32.xlu0 %v674_v50, %s1124_s19  ;;  %676 = vrot.lane.b32.xlu2 %v672_v23, %s1124_s19 }
 0x18e   : > { %726 = vperm.xlu1 %1081, %v712_v61  }
 0x195   : > { %678 = vrot.lane.b32.xlu0 %v673_v38, %s1124_s19  ;;  %731 = vperm.xlu2 %1082, %v713_v62  }
 0x196   : > { %721 = vperm.xlu1 %1081, %v711_v63  }
 0x19d   : > { %716 = vperm.xlu0 %1083, %v710_v0  }
 0x1d7   : > { %v693_v1 = vpop.permute.xlu2 %692 }
 0x1d8   : > { %v698_v5 = vmul.f32 %v1240_v31, %v693_v1 }
 0x1df   : > { %v691_v2 = vpop.permute.xlu2 %690  ;;  %v689_v3 = vpop.permute.xlu1 %688 }
 0x1e0   : > { %v697_v8 = vmul.f32 %v1240_v31, %v691_v2  ;;  %v696_v9 = vmul.f32 %v1240_v31, %v689_v3 }
 0x1e2   : > { %v708_v12 = vpack.c.bf16 %v697_v8, %v696_v9 }
 0x1e7   : > { %v677_v19 = vpop.permute.xlu2 %676 }
 0x1e8   : > { %v684_v22 = vmul.f32 %v1237_v29, %v677_v19 }
 0x1ef   : > { %v732_v42 = vpop.permute.xlu2 %731 }
 0x1f7   : > { %v695_v4 = vpop.permute.xlu0 %694 }
 0x1f8   : > { %v699_v6 = vmul.f32 %v1240_v31, %v695_v4  ;;  %v683_v14 = vpop.permute.xlu1 %682 }
 0x1f9   : > { %v687_v18 = vmul.f32 %v1237_v29, %v683_v14 }
 0x1fa   : > { %v709_v10 = vpack.c.bf16 %v699_v6, %v698_v5 }
 0x1fc   : > { %753 = vmatpush.bf16.msra.mxu1 %v709_v10  ;;  %1057 = vmatpush.bf16.msra.mxu3 %v709_v10 }
 0x1ff   : > { %v681_v13 = vpop.permute.xlu0 %680 }
 0x200   : > { %754 = vmatpush.bf16.msra.mxu1 %v708_v12  ;;  %1058 = vmatpush.bf16.msra.mxu3 %v708_v12  ;;  %v686_v16 = vmul.f32 %v1237_v29, %v681_v13  ;;  %v727_v26 = vpop.permute.xlu1 %726 }
 0x202   : > { %v705_v21 = vpack.c.bf16 %v687_v18, %v686_v16 }
 0x204   : > { %755 = vmatpush.bf16.msra.mxu1 %v707_v60  ;;  %1059 = vmatpush.bf16.msra.mxu3 %v707_v60 }
 0x207   : > { %v679_v17 = vpop.permute.xlu0 %678 }
 0x208   : > { %756 = vmatpush.bf16.msra.mxu1 %v706_v43  ;;  %1060 = vmatpush.bf16.msra.mxu3 %v706_v43  ;;  %v685_v20 = vmul.f32 %v1237_v29, %v679_v17  ;;  %v722_v35 = vpop.permute.xlu1 %721 }
 0x20a   : > { %v704_v23 = vpack.c.bf16 %v685_v20, %v684_v22 }
 0x20c   : > { %757 = vmatpush.bf16.msra.mxu1 %v705_v21  ;;  %1061 = vmatpush.bf16.msra.mxu3 %v705_v21 }
 0x20f   : > { %v717_v27 = vpop.permute.xlu0 %716 }
 0x210   : > { %758 = vmatpush.bf16.msra.mxu1 %v704_v23  ;;  %1062 = vmatpush.bf16.msra.mxu3 %v704_v23 }
 0x213   : > { %1043 = vmatmul.msk.bf16.vlgmr.msra.gmra.mxu1 %vm744_vm7, %v1055_v24  ;;  %1044 = vmatmul.msk.bf16.vlgmr.msra.gmra.mxu3 %vm744_vm7, %v1056_v25 }
 0x290   : > { %v760_v28 = vpop.f32.mrf.mxu1 }
 0x291   : > { %v761_v30 = vadd.f32 %v760_v28, %v717_v27 }
 0x293   : > { %v1045_v32 = vmul.f32 -1.442695, %v761_v30 }
 0x295   : > { %1100 = vpow2.f32 %v1045_v32 }
 0x296   : > { %v765_v33 = vpop.f32.mrf.mxu3 }
 0x297   : > { %v1293_v34 = vadd.f32 %v765_v33, %v727_v26 }
 0x298   : > { %v762_v36 = vpop.f32.mrf.mxu1 }
 0x299   : > { %v1047_v37 = vmul.f32 -1.442695, %v1293_v34  ;;  %v1296_v38 = vadd.f32 %v762_v36, %v722_v35 }
 0x29b   : > { %v1101_v39 = vpop.eup %1100  ;;  %1102 = vpow2.f32 %v1047_v37  ;;  %v1046_v40 = vmul.f32 -1.442695, %v1296_v38 }
 0x29c   : > { %v782_v41 = vadd.f32 1.0, %v1101_v39 }
 0x29d   : > { %1104 = vpow2.f32 %v1046_v40 }
 0x29e   : > { %1106 = vrcp.f32 %v782_v41  ;;  %v767_v43 = vpop.f32.mrf.mxu3  ;;  %v797_v53 = vand.u32 2147483648, %v782_v41  ;;  %v795_v56 = vand.u32 2147483647, %v782_v41  ;;  %vm791_vm9 = vweird.f32 %v782_v41 }
 0x29f   : > { %v1299_v44 = vadd.f32 %v767_v43, %v732_v42 }
 0x2a0   : > { %v798_v61 = vor.u32 1.1754944e-38, %v797_v53  ;;  %vm796_vm11 = vcmp.eq.f32.partialorder %v795_v56, 8.507059e+37 }
 0x2a1   : > { %v1103_v45 = vpop.eup %1102  ;;  %v1048_v46 = vmul.f32 -1.442695, %v1299_v44 }
 0x2a2   : > { %v784_v47 = vadd.f32 1.0, %v1103_v45 }
 0x2a3   : > { %v1105_v48 = vpop.eup %1104  ;;  %1108 = vpow2.f32 %v1048_v46 }
 0x2a4   : > { %v1107_v49 = vpop.eup %1106  ;;  %1110 = vrcp.f32 %v784_v47  ;;  %v783_v51 = vadd.f32 1.0, %v1105_v48  ;;  %v827_v2 = vand.u32 2147483648, %v784_v47  ;;  %v825_v6 = vand.u32 2147483647, %v784_v47 }
 0x2a5   : > { %v787_v50 = vmul.f32 %v1107_v49, %v782_v41  ;;  %vm792_vm8 = vweird.f32 %v1107_v49  ;;  %vm821_vm13 = vweird.f32 %v784_v47 }
 0x2a6   : > { %1112 = vrcp.f32 %v783_v51  ;;  %vm793_vm10 = vmor %vm791_vm9, %vm792_vm8  ;;  %v812_v10 = vand.u32 2147483648, %v783_v51  ;;  %v828_v13 = vor.u32 1.1754944e-38, %v827_v2  ;;  %v810_v16 = vand.u32 2147483647, %v783_v51 }
 0x2a7   : > { %v788_v52 = vsub.f32 1.0, %v787_v50  ;;  %vm826_vm1 = vcmp.eq.f32.partialorder %v825_v6, 8.507059e+37  ;;  %vm806_vm2 = vweird.f32 %v783_v51 }
 0x2a8   : > { %v813_v22 = vor.u32 1.1754944e-38, %v812_v10  ;;  %vm811_vm4 = vcmp.eq.f32.partialorder %v810_v16, 8.507059e+37 }
 0x2a9   : > { %v1109_v54 = vpop.eup %1108  ;;  %v789_v55 = vmul.f32 %v1107_v49, %v788_v52 }
 0x2aa   : > { %v1111_v57 = vpop.eup %1110  ;;  %v785_v58 = vadd.f32 1.0, %v1109_v54 }
 0x2ab   : > { %v790_v59 = vadd.f32 %v1107_v49, %v789_v55  ;;  %v817_v60 = vmul.f32 %v1111_v57, %v784_v47  ;;  %vm822_vm12 = vweird.f32 %v1111_v57 }
 0x2ac   : > { %1114 = vrcp.f32 %v785_v58  ;;  %v1113_v62 = vpop.eup %1112  ;;  %vm823_vm14 = vmor %vm821_vm13, %vm822_vm12  ;;  %v842_v25 = vand.u32 2147483648, %v785_v58  ;;  %v840_v28 = vand.u32 2147483647, %v785_v58  ;;  %vm836_vm6 = vweird.f32 %v785_v58 }
 0x2ad   : > { %v794_v63 = vsel %vm793_vm10, %v1107_v49, %v790_v59  ;;  %v818_v0 = vsub.f32 1.0, %v817_v60  ;;  %v802_v3 = vmul.f32 %v1113_v62, %v783_v51  ;;  %vm807_vm15 = vweird.f32 %v1113_v62  ;;  %v874_v59 = vld [vmem:[%s1353_s9] sm:$0x1] }
 0x2ae   : > { %v799_v1 = vsel %vm796_vm11, %v798_v61, %v794_v63  ;;  %vm808_vm3 = vmor %vm806_vm2, %vm807_vm15  ;;  %v843_v33 = vor.u32 1.1754944e-38, %v842_v25  ;;  %vm841_vm9 = vcmp.eq.f32.partialorder %v840_v28, 8.507059e+37 }
 0x2af   : > { %v1302_v4 = vmul.f32 %v799_v1, %v761_v30  ;;  %v819_v5 = vmul.f32 %v1111_v57, %v818_v0  ;;  %v803_v8 = vsub.f32 1.0, %v802_v3 }
 0x2b1   : > { %v820_v9 = vadd.f32 %v1111_v57, %v819_v5  ;;  %862 = vrot.lane.b32.xlu1 %v1302_v4, %s1125_s20  ;;  %v804_v14 = vmul.f32 %v1113_v62, %v803_v8 }
 0x2b2   : > { %v1115_v12 = vpop.eup %1114 }
 0x2b3   : > { %v824_v17 = vsel %vm823_vm14, %v1111_v57, %v820_v9  ;;  %v832_v18 = vmul.f32 %v1115_v12, %v785_v58  ;;  %v805_v20 = vadd.f32 %v1113_v62, %v804_v14  ;;  %vm837_vm5 = vweird.f32 %v1115_v12 }
 0x2b4   : > { %v829_v19 = vsel %vm826_vm1, %v828_v13, %v824_v17  ;;  %vm838_vm8 = vmor %vm836_vm6, %vm837_vm5 }
 0x2b5   : > { %v848_v21 = vmul.f32 %v829_v19, %v1293_v34  ;;  %v833_v23 = vsub.f32 1.0, %v832_v18  ;;  %v809_v24 = vsel %vm808_vm3, %v1113_v62, %v805_v20 }
 0x2b6   : > { %v814_v26 = vsel %vm811_vm4, %v813_v22, %v809_v24 }
 0x2b7   : > { %v834_v27 = vmul.f32 %v1115_v12, %v833_v23  ;;  %866 = vrot.lane.b32.xlu2 %v848_v21, %s1125_s20  ;;  %v847_v30 = vmul.f32 %v814_v26, %v1296_v38  ;;  %v881_v38 = vld [vmem:[%s1354_s10] sm:$0x3] }
 0x2b9   : > { %v835_v32 = vadd.f32 %v1115_v12, %v834_v27  ;;  %v877_v34 = vpack.c.bf16 %v847_v30, %v1302_v4 }
 0x2bb   : > { %v839_v35 = vsel %vm838_vm8, %v1115_v12, %v835_v32 }
 0x2bc   : > { %v844_v36 = vsel %vm841_vm9, %v843_v33, %v839_v35 }
 0x2bd   : > { %v849_v37 = vmul.f32 %v844_v36, %v1299_v44 }
 0x2bf   : > { %868 = vrot.lane.b32.xlu0 %v849_v37, %s1125_s20  ;;  %864 = vrot.lane.b32.xlu2 %v847_v30, %s1125_s20  ;;  %v878_v39 = vpack.c.bf16 %v849_v37, %v848_v21 }
 0x2c0   : > { %856 = vrot.lane.b32.xlu1 %v849_v37, %s1124_s19 }
 0x2c7   : > { %854 = vrot.lane.b32.xlu0 %v848_v21, %s1124_s19  ;;  %850 = vrot.lane.b32.xlu2 %v1302_v4, %s1124_s19 }
 0x2c8   : > { %884 = vperm.xlu1 %1081, %v881_v38  }
 0x2cf   : > { %852 = vrot.lane.b32.xlu0 %v847_v30, %s1124_s19 }
 0x311   : > { %v867_v40 = vpop.permute.xlu2 %866 }
 0x312   : > { %v872_v43 = vmul.f32 %v1240_v31, %v867_v40 }
 0x319   : > { %v865_v45 = vpop.permute.xlu2 %864 }
 0x31a   : > { %v871_v48 = vmul.f32 %v1240_v31, %v865_v45 }
 0x321   : > { %v851_v55 = vpop.permute.xlu2 %850 }
 0x322   : > { %v858_v58 = vmul.f32 %v1237_v29, %v851_v55 }
 0x323   : > { %v863_v41 = vpop.permute.xlu1 %862 }
 0x324   : > { %v870_v46 = vmul.f32 %v1240_v31, %v863_v41 }
 0x326   : > { %v879_v49 = vpack.c.bf16 %v871_v48, %v870_v46 }
 0x331   : > { %v869_v42 = vpop.permute.xlu0 %868 }
 0x332   : > { %v873_v44 = vmul.f32 %v1240_v31, %v869_v42  ;;  %v857_v51 = vpop.permute.xlu1 %856 }
 0x333   : > { %v861_v54 = vmul.f32 %v1237_v29, %v857_v51 }
 0x334   : > { %v880_v47 = vpack.c.bf16 %v873_v44, %v872_v43 }
 0x336   : > { %892 = vmatpush.bf16.msra.mxu2 %v880_v47 }
 0x339   : > { %v855_v50 = vpop.permute.xlu0 %854 }
 0x33a   : > { %893 = vmatpush.bf16.msra.mxu2 %v879_v49  ;;  %v860_v52 = vmul.f32 %v1237_v29, %v855_v50  ;;  %v885_v60 = vpop.permute.xlu1 %884 }
 0x33c   : > { %v876_v57 = vpack.c.bf16 %v861_v54, %v860_v52 }
 0x33e   : > { %894 = vmatpush.bf16.msra.mxu2 %v878_v39 }
 0x341   : > { %v853_v53 = vpop.permute.xlu0 %852 }
 0x342   : > { %895 = vmatpush.bf16.msra.mxu2 %v877_v34  ;;  %v859_v56 = vmul.f32 %v1237_v29, %v853_v53 }
 0x344   : > { %v875_v31 = vpack.c.bf16 %v859_v56, %v858_v58 }
 0x346   : > { %896 = vmatpush.bf16.msra.mxu2 %v876_v57 }
 0x34a   : > { %897 = vmatpush.bf16.msra.mxu2 %v875_v31 }
 0x34d   : > { %1049 = vmatmul.msk.bf16.vlgmr.msra.gmra.mxu2 %vm744_vm7, %v874_v59 }
 0x3d0   : > { %v899_v61 = vpop.f32.mrf.mxu2 }
 0x3d1   : > { %v900_v62 = vadd.f32 %v899_v61, %v885_v60 }
 0x3d3   : > { %v903_v63 = vsub.f32 %v900_v62, %v481_v15 }
 0x3d5   : > { %v904_v0 = vmul.f32 %v903_v63, %v903_v63 }
 0x3d7   : > { %v905_v29 = vsel %vm490_vm0, %v904_v0, 0.0 }
 0x3d8   : > { %v906_v1 = vrot.slane %v905_v29, 4  ;;  %v901_v2 = vpop.f32.mrf.mxu2 }
 0x3da   : > { %v907_v3 = vadd.f32 %v906_v1, %v905_v29 }
 0x3dc   : > { %v908_v4 = vrot.slane %v907_v3, 2 }
 0x3de   : > { %v909_v5 = vadd.f32 %v908_v4, %v907_v3 }
 0x3e0   : > { %v910_v6 = vrot.slane %v909_v5, 1 }
 0x3e2   : > { %v911_v8 = vadd.f32 %v910_v6, %v909_v5 }
 0x3e4   : > { %912 = vst [vmem:[%s450_s23] sm:$0x1] %v911_v8 }
 0x3e5 PF: > { %s21_s17 = sadd.s32 1, %s1122_s17  }
 0x3e6   : > { %p18_p4 = scmp.ge.s32.totalorder %s21_s17, 4  }
 0x3e8   :  { %20 = sbr.rel (!%p18_p4) target bundleno = 1 (0x1), region = 106 }

</bundles_post_ra>
